<compile_context>
chip_gen: v7x
topology: tpu7x:2x2x1
jax: 0.10.0
libtpu: 0.0.40
codegen_flags: <defaults>
</compile_context>

<pallas_src>
import functools

import jax
import jax.numpy as jnp
from jax.experimental import pallas as pl
from jax.experimental.pallas import tpu as pltpu


def _round_up(n, m):
    return ((n + m - 1) // m) * m


def cnn_kernel(x_ref, w_ref, mask_ref, b_ref, o_ref, *, chunk_rows):
    """One batch tile.

    x_ref:    (TB, C*M)      bf16/f32  flat chars, lane index = c*M + s
    w_ref:    (C*M, G*128)   bf16/f32  block-Toeplitz conv weights (resident)
    mask_ref: (1, 128)       f32       0 on valid time cols, -1e30 on pad cols
    b_ref:    (1, O)         f32       conv bias (resident)
    o_ref:    (TB, O)                  max-over-time(relu(conv))
    """
    TB = x_ref.shape[0]
    G = w_ref.shape[1] // 128
    O = o_ref.shape[1]

    bias = b_ref[...]      # (1, O)
    mask = mask_ref[...]   # (1, 128)

    def do_chunk(r0, rows):
        xc = x_ref[pl.ds(r0, rows), :]                         # (rows, C*M)
        # Group 0 initialises the running max (no zeros init / extra add).
        m = jnp.dot(xc, w_ref[:, 0:128],
                    preferred_element_type=jnp.float32)        # (rows, 128) f32
        for gi in range(1, G - 1):
            z = jnp.dot(xc, w_ref[:, gi * 128:(gi + 1) * 128],
                        preferred_element_type=jnp.float32)
            m = jnp.maximum(m, z)
        if G > 1:
            z = jnp.dot(xc, w_ref[:, (G - 1) * 128:G * 128],
                        preferred_element_type=jnp.float32)
            m = jnp.maximum(m, z + mask)     # kill padded time columns
        else:
            m = m + mask
        # Fold the g = 128 // O time slots living inside one 128-lane block.
        width = 128
        while width > O:
            width //= 2
            m = jnp.maximum(m[:, :width], m[:, width:2 * width])
        # max_t relu(z_t + b) == relu(b + max_t z_t)  (ReLU monotone, b const)
        o_ref[pl.ds(r0, rows), :] = jnp.maximum(m + bias, 0.0).astype(o_ref.dtype)

    n_full = TB // chunk_rows
    tail = TB % chunk_rows
    if n_full == 1:
        do_chunk(0, chunk_rows)
    elif n_full > 1:
        def body(j, carry):
            do_chunk(pl.multiple_of(j * chunk_rows, chunk_rows), chunk_rows)
            return carry
        jax.lax.fori_loop(0, n_full, body, 0)
    if tail:
        do_chunk(n_full * chunk_rows, tail)


def _choose_batch_tiling(B, target):
    """Pick (tile_rows, padded_batch, num_tiles) minimizing padding waste."""
    Bu = _round_up(max(B, 1), 8)
    num_tiles = max(1, -(-Bu // max(target, 8)))
    # v7x shards the 'parallel' grid axis over 2 TensorCores: give the grid
    # >= 2 steps once there is enough work to be worth splitting.
    if num_tiles == 1 and Bu >= 256:
        num_tiles = 2
    TB = _round_up(-(-Bu // num_tiles), 8)
    return TB, TB * num_tiles, num_tiles


def cnn_forward(x, w, b, *, batch_tile=512, compute_dtype=jnp.bfloat16):
    """x: (B, e_char, m_word), w: (e_word, e_char, K), b: (e_word,) -> (B, e_word)."""
    B, C, M = x.shape
    O, Cw, K = w.shape
    assert Cw == C, "channel mismatch"
    L = M - K + 1
    if L < 1:
        raise ValueError("m_word must be >= kernel_size")
    if O > 128 or 128 % O != 0:
        # TODO(synk): general e_word (only e_word dividing 128 is packed here).
        raise NotImplementedError("e_word must divide 128")
    g = 128 // O                      # conv time-steps packed per 128-lane block
    L_pad = _round_up(L, g)
    G = L_pad // g
    CM = C * M

    # Block-Toeplitz weight: wt[c*M + t + k, t*O + o] = w[o, c, k]; zero elsewhere.
    w_cko = jnp.transpose(w, (1, 2, 0)).astype(compute_dtype)          # (C, K, O)
    zero_col = jnp.zeros((CM, O), dtype=w_cko.dtype)
    cols = []
    for t in range(L_pad):
        if t < L:
            cols.append(jnp.pad(w_cko, ((0, 0), (t, M - K - t), (0, 0))).reshape(CM, O))
        else:
            cols.append(zero_col)
    wt = jnp.concatenate(cols, axis=1)                                 # (CM, G*128)

    # Additive mask for the LAST 128-lane group: 0 on valid time cols, -1e30 on pad.
    last_t0 = (G - 1) * g
    mask = jnp.repeat(
        jnp.asarray([0.0 if (last_t0 + j) < L else -1e30 for j in range(g)],
                    dtype=jnp.float32), O).reshape(1, 128)

    b2 = b.reshape(1, O).astype(jnp.float32)
    x_flat = x.reshape(B, CM).astype(compute_dtype)

    TB, B_pad, num_tiles = _choose_batch_tiling(B, batch_tile)
    if B_pad != B:
        x_flat = jnp.pad(x_flat, ((0, B_pad - B), (0, 0)))
    chunk_rows = min(128, TB)          # keeps the live accumulator <= ~16 vregs

    kernel = functools.partial(cnn_kernel, chunk_rows=chunk_rows)
    out = pl.pallas_call(
        kernel,
        out_shape=jax.ShapeDtypeStruct((B_pad, O), x.dtype),
        grid_spec=pltpu.PrefetchScalarGridSpec(
            num_scalar_prefetch=0,
            grid=(num_tiles,),
            in_specs=[
                pl.BlockSpec((TB, CM), lambda i: (i, 0)),        # streamed activations
                pl.BlockSpec((CM, G * 128), lambda i: (0, 0)),   # resident Toeplitz weight
                pl.BlockSpec((1, 128), lambda i: (0, 0)),        # resident pad mask
                pl.BlockSpec((1, O), lambda i: (0, 0)),          # resident bias
            ],
            out_specs=pl.BlockSpec((TB, O), lambda i: (i, 0)),
        ),
        compiler_params=pltpu.CompilerParams(
            dimension_semantics=("parallel",)),
    )(x_flat, wt, mask, b2)

    return out[:B]


def cnn_reference(x, w, b):
    """Plain-JAX reference of Conv1d -> ReLU -> max over time."""
    B, C, M = x.shape
    O, _, K = w.shape
    L = M - K + 1
    acc = jnp.zeros((B, O, L), dtype=jnp.float32)
    for k in range(K):
        # out[b,o,t] += sum_c w[o,c,k] * x[b,c,t+k]
        acc = acc + jnp.einsum('oc,bct->bot', w[:, :, k], x[:, :, k:k + L])
    acc = acc + b[None, :, None]
    acc = jnp.maximum(acc, 0.0)
    return jnp.max(acc, axis=2)


if __name__ == "__main__":
    # Shapes consistent with the module: e_char=4 (input_c), e_word=32 (output_c),
    # m_word=21, kernel_size=5, batch=2.
    batch, e_char, e_word, m_word, K = 2, 4, 32, 21, 5

    key = jax.random.PRNGKey(0)
    kx, kw, kb = jax.random.split(key, 3)

    x = jax.random.normal(kx, (batch, e_char, m_word), dtype=jnp.float32)

    # Deterministic param init mimicking PyTorch Conv1d default:
    # uniform(-sqrt(1/(in_c*K)), +sqrt(1/(in_c*K)))
    bound = (1.0 / (e_char * K)) ** 0.5
    w = jax.random.uniform(kw, (e_word, e_char, K), dtype=jnp.float32,
                           minval=-bound, maxval=bound)
    b = jax.random.uniform(kb, (e_word,), dtype=jnp.float32,
                           minval=-bound, maxval=bound)

    def check(xi, *, dtype=jnp.bfloat16, **kwargs):
        out = jax.block_until_ready(
            cnn_forward(xi, w, b, compute_dtype=dtype, **kwargs))
        assert out.shape == (xi.shape[0], e_word)
        if dtype == jnp.float32:
            ref = cnn_reference(xi, w, b)
            assert jnp.allclose(out, ref, atol=1e-4, rtol=1e-4), "f32 mismatch"
        else:
            # Tight check vs reference on bf16-rounded inputs (products are exact
            # in f32; only accumulation order differs).
            ref_r = cnn_reference(xi.astype(dtype).astype(jnp.float32),
                                  w.astype(dtype).astype(jnp.float32), b)
            assert jnp.allclose(out, ref_r, atol=1e-4, rtol=1e-4), "bf16 mismatch"
            # Loose sanity check vs the exact f32 reference.
            ref = cnn_reference(xi, w, b)
            assert jnp.allclose(out, ref, atol=5e-2, rtol=5e-2), "bf16 far from f32"
        return out

    # batch=2 (single tiny tile)
    check(x)
    # batch not a multiple of the sublane tile (exercises padding path)
    check(jax.random.normal(jax.random.PRNGKey(1), (19, e_char, m_word), jnp.float32))
    # larger batch: exercises 2-step grid, inner fori_loop chunk + tail chunk
    check(jax.random.normal(jax.random.PRNGKey(2), (300, e_char, m_word), jnp.float32))
    # full-precision path, tight tolerance vs the exact f32 reference
    check(jax.random.normal(jax.random.PRNGKey(3), (19, e_char, m_word), jnp.float32),
          dtype=jnp.float32)

    print("KERNEL_OK")
</pallas_src>

<mosaic_0001>
module attributes {stable_mosaic.version = 11 : i64} {
  func.func @cnn_kernel(%arg0: i32, %arg1: memref<8x84xbf16, #tpu.memory_space<vmem>>, %arg2: memref<84x640xbf16, #tpu.memory_space<vmem>>, %arg3: memref<1x128xf32, #tpu.memory_space<vmem>>, %arg4: memref<1x32xf32, #tpu.memory_space<vmem>>, %arg5: memref<8x32xf32, #tpu.memory_space<vmem>>) attributes {dimension_semantics = [#tpu.dimension_semantics<parallel>], iteration_bounds = array<i64: 1>, scalar_prefetch = 0 : i64, scratch_operands = 0 : i64, tpu.core_type = #tpu.core_type<tc>, window_params = [{transform_indices = @transform_0, window_bounds = array<i64: 8, 84>}, {pipeline_mode = #tpu.pipeline_mode<synchronous>, transform_indices = @transform_1, window_bounds = array<i64: 84, 640>}, {pipeline_mode = #tpu.pipeline_mode<synchronous>, transform_indices = @transform_2, window_bounds = array<i64: 1, 128>}, {pipeline_mode = #tpu.pipeline_mode<synchronous>, transform_indices = @transform_3, window_bounds = array<i64: 1, 32>}, {transform_indices = @transform_4, window_bounds = array<i64: 8, 32>}]} {
    %c0 = arith.constant 0 : index
    %c0_0 = arith.constant 0 : index
    %0 = vector.load %arg4[%c0, %c0_0] : memref<1x32xf32, #tpu.memory_space<vmem>>, vector<1x32xf32>
    %c0_1 = arith.constant 0 : index
    %c0_2 = arith.constant 0 : index
    %1 = vector.load %arg3[%c0_1, %c0_2] : memref<1x128xf32, #tpu.memory_space<vmem>>, vector<1x128xf32>
    %c0_3 = arith.constant 0 : index
    %c0_4 = arith.constant 0 : index
    %2 = vector.load %arg1[%c0_3, %c0_4] : memref<8x84xbf16, #tpu.memory_space<vmem>>, vector<8x84xbf16>
    %c0_5 = arith.constant 0 : index
    %c0_6 = arith.constant 0 : index
    %3 = vector.load %arg2[%c0_5, %c0_6] : memref<84x640xbf16, #tpu.memory_space<vmem>>, vector<84x128xbf16>
    %cst = arith.constant dense<0.000000e+00> : vector<8x128xf32>
    %4 = tpu.matmul %2, %3, %cst {dimension_numbers = #tpu.dot_dimension_numbers<[1], [0], [0], [1], [0, 0, 1, 1], [], []>} : vector<8x84xbf16>, vector<84x128xbf16>, vector<8x128xf32> -> vector<8x128xf32>
    %c0_7 = arith.constant 0 : index
    %c128 = arith.constant 128 : index
    %5 = vector.load %arg2[%c0_7, %c128] : memref<84x640xbf16, #tpu.memory_space<vmem>>, vector<84x128xbf16>
    %cst_8 = arith.constant dense<0.000000e+00> : vector<8x128xf32>
    %6 = tpu.matmul %2, %5, %cst_8 {dimension_numbers = #tpu.dot_dimension_numbers<[1], [0], [0], [1], [0, 0, 1, 1], [], []>} : vector<8x84xbf16>, vector<84x128xbf16>, vector<8x128xf32> -> vector<8x128xf32>
    %7 = arith.maximumf %4, %6 : vector<8x128xf32>
    %c0_9 = arith.constant 0 : index
    %c256 = arith.constant 256 : index
    %8 = vector.load %arg2[%c0_9, %c256] : memref<84x640xbf16, #tpu.memory_space<vmem>>, vector<84x128xbf16>
    %cst_10 = arith.constant dense<0.000000e+00> : vector<8x128xf32>
    %9 = tpu.matmul %2, %8, %cst_10 {dimension_numbers = #tpu.dot_dimension_numbers<[1], [0], [0], [1], [0, 0, 1, 1], [], []>} : vector<8x84xbf16>, vector<84x128xbf16>, vector<8x128xf32> -> vector<8x128xf32>
    %10 = arith.maximumf %7, %9 : vector<8x128xf32>
    %c0_11 = arith.constant 0 : index
    %c384 = arith.constant 384 : index
    %11 = vector.load %arg2[%c0_11, %c384] : memref<84x640xbf16, #tpu.memory_space<vmem>>, vector<84x128xbf16>
    %cst_12 = arith.constant dense<0.000000e+00> : vector<8x128xf32>
    %12 = tpu.matmul %2, %11, %cst_12 {dimension_numbers = #tpu.dot_dimension_numbers<[1], [0], [0], [1], [0, 0, 1, 1], [], []>} : vector<8x84xbf16>, vector<84x128xbf16>, vector<8x128xf32> -> vector<8x128xf32>
    %13 = arith.maximumf %10, %12 : vector<8x128xf32>
    %c0_13 = arith.constant 0 : index
    %c512 = arith.constant 512 : index
    %14 = vector.load %arg2[%c0_13, %c512] : memref<84x640xbf16, #tpu.memory_space<vmem>>, vector<84x128xbf16>
    %cst_14 = arith.constant dense<0.000000e+00> : vector<8x128xf32>
    %15 = tpu.matmul %2, %14, %cst_14 {dimension_numbers = #tpu.dot_dimension_numbers<[1], [0], [0], [1], [0, 0, 1, 1], [], []>} : vector<8x84xbf16>, vector<84x128xbf16>, vector<8x128xf32> -> vector<8x128xf32>
    %16 = vector.broadcast %1 : vector<1x128xf32> to vector<8x128xf32>
    %17 = arith.addf %15, %16 : vector<8x128xf32>
    %18 = arith.maximumf %13, %17 : vector<8x128xf32>
    %19 = vector.extract_strided_slice %18 {offsets = [0, 0], sizes = [8, 64], strides = [1, 1]} : vector<8x128xf32> to vector<8x64xf32>
    %20 = vector.extract_strided_slice %18 {offsets = [0, 64], sizes = [8, 64], strides = [1, 1]} : vector<8x128xf32> to vector<8x64xf32>
    %21 = arith.maximumf %19, %20 : vector<8x64xf32>
    %22 = vector.extract_strided_slice %21 {offsets = [0, 0], sizes = [8, 32], strides = [1, 1]} : vector<8x64xf32> to vector<8x32xf32>
    %23 = vector.extract_strided_slice %21 {offsets = [0, 32], sizes = [8, 32], strides = [1, 1]} : vector<8x64xf32> to vector<8x32xf32>
    %24 = arith.maximumf %22, %23 : vector<8x32xf32>
    %25 = vector.broadcast %0 : vector<1x32xf32> to vector<8x32xf32>
    %26 = arith.addf %24, %25 : vector<8x32xf32>
    %cst_15 = arith.constant 0.000000e+00 : f32
    %27 = vector.broadcast %cst_15 : f32 to vector<8x32xf32>
    %28 = arith.maximumf %26, %27 : vector<8x32xf32>
    %c0_16 = arith.constant 0 : index
    %c0_17 = arith.constant 0 : index
    %29 = vector.load %arg5[%c0_16, %c0_17] : memref<8x32xf32, #tpu.memory_space<vmem>>, vector<8x32xf32>
    tpu.vector_store %arg5[%c0_16, %c0_17], %28 {strides = array<i32>} : memref<8x32xf32, #tpu.memory_space<vmem>>, vector<8x32xf32>,
    return
  }
  func.func @transform_0(%arg0: i32) -> (i32, i32) {
    %c0_i32 = arith.constant 0 : i32
    %c0_i32_0 = arith.constant 0 : i32
    return %arg0, %c0_i32 : i32, i32
  }
  func.func @transform_1(%arg0: i32) -> (i32, i32) {
    %c0_i32 = arith.constant 0 : i32
    %c0_i32_0 = arith.constant 0 : i32
    %c0_i32_1 = arith.constant 0 : i32
    return %c0_i32, %c0_i32_0 : i32, i32
  }
  func.func @transform_2(%arg0: i32) -> (i32, i32) {
    %c0_i32 = arith.constant 0 : i32
    %c0_i32_0 = arith.constant 0 : i32
    %c0_i32_1 = arith.constant 0 : i32
    return %c0_i32, %c0_i32_0 : i32, i32
  }
  func.func @transform_3(%arg0: i32) -> (i32, i32) {
    %c0_i32 = arith.constant 0 : i32
    %c0_i32_0 = arith.constant 0 : i32
    %c0_i32_1 = arith.constant 0 : i32
    return %c0_i32, %c0_i32_0 : i32, i32
  }
  func.func @transform_4(%arg0: i32) -> (i32, i32) {
    %c0_i32 = arith.constant 0 : i32
    %c0_i32_0 = arith.constant 0 : i32
    return %arg0, %c0_i32 : i32, i32
  }
}

</mosaic_0001>

<bundles_post_ra>
// kernel: tpu_custom_call.1
= control target key start
LH: loop header
LB: loop body
LE: loop exit
PB: predicated region body
PF: predicated region fallthrough
CT: control target
= control target key end

     0   :  { %9 = vsyncpa [#allocation3], 0  ;;  %s937_s0 = inlined_call_operand.hbm [shape: bf16[8,84], index: 0, kind: input, shape index: {}]   ;;  %s938_s1 = inlined_call_operand.hbm [shape: bf16[84,640], index: 1, kind: input, shape index: {}]   ;;  %s939_s2 = inlined_call_operand.vmem [shape: f32[1,128], index: 2, kind: input, shape index: {}]   ;;  %s940_s3 = inlined_call_operand.vmem [shape: f32[1,32], index: 3, kind: input, shape index: {}]   ;;  %s941_s4 = inlined_call_operand.hbm [shape: f32[8,32], index: 4, kind: output, shape index: {}]  }
   0x1   :  { %10 = vsyncpa [#allocation6], 0 }
   0x2   :  { %11 = vsyncpa [#allocation4], 0  ;;  %s797_s15 = smov [#allocation2]   ;;  %s798_s17 = smov [#allocation5]  }
   0x3   :  { %s18_s16 = sshll.u32 %s797_s15, 4  ;;  %s27_s18 = sshll.u32 %s798_s17, 4  ;;  %s19_s16 = int_to_ptr.vmem [resolvable:$true] %s18_s16  ;;  %s831_s18 = int_to_ptr.vmem [resolvable:$true] %s27_s18 }
   0x4   :  { %s725_s21 = scalar_lea.hbm %s937_s0, 64 }
   0x5   :  { %p726_p0 = scmp.ne.s32.totalorder %s937_s0, %s725_s21  ;;  %p729_p1 = scmp.lt.u32.totalorder %s725_s21, %s937_s0 }
   0x7   :  { %p731_p2 = pnand %p729_p1, %p726_p0 }
   0x9   :  { %734 = shalt.err (!%p731_p2)
}
   0xa   :  { %s735_s26 = scalar_lea.vmem %s19_s16, 64  ;;  %p740_p4 = scmp.lt.s32.totalorder %s19_s16, %s19_s16 }
   0xb   :  { %p736_p3 = scmp.ne.s32.totalorder %s19_s16, %s735_s26  ;;  %p741_p5 = scmp.lt.s32.totalorder %s735_s26, %s735_s26 }
   0xd   :  { %p742_p6 = por %p741_p5, %p740_p4 }
   0xf   :  { %p743_p7 = pnand %p742_p6, %p736_p3 }
  0x11   :  { %746 = shalt.err (!%p743_p7)
}
  0x12   :  { %21 = dma.hbm_to_vmem [thread:$0]  %s937_s0, 64, %s19_s16, [#allocation3]  }
  0x13   :  { %s747_s5 = scalar_lea.hbm %s938_s1, 3520 }
  0x14   :  { %p748_p8 = scmp.ne.s32.totalorder %s938_s1, %s747_s5  ;;  %p751_p9 = scmp.lt.u32.totalorder %s747_s5, %s938_s1 }
  0x16   :  { %p753_p10 = pnand %p751_p9, %p748_p8 }
  0x18   :  { %756 = shalt.err (!%p753_p10)
}
  0x19   :  { %s757_s10 = scalar_lea.vmem %s831_s18, 3520  ;;  %p762_p12 = scmp.lt.s32.totalorder %s831_s18, %s831_s18 }
  0x1a   :  { %p758_p11 = scmp.ne.s32.totalorder %s831_s18, %s757_s10  ;;  %p763_p13 = scmp.lt.s32.totalorder %s757_s10, %s757_s10 }
  0x1c   :  { %p764_p0 = por %p763_p13, %p762_p12 }
  0x1e   :  { %p765_p1 = pnand %p764_p0, %p758_p11 }
  0x20   :  { %768 = shalt.err (!%p765_p1)
}
  0x21   :  { %s799_s0 = smov 320   ;;  %s800_s11 = smov 20  }
  0x22   :  { %33 = dma.hbm_to_vmem [thread:$0]  %s938_s1, 3520, %s831_s18, [#allocation6], %s799_s0, %s799_s0, %s800_s11  }
  0x23   :  { %791 = dma.done.wait [#allocation3], 64  }
  0x24   :  { %792 = vsyncadd [#allocation3], 4294967232 }
  0x25   :  { %793 = dma.done.wait [#allocation6], 3520  }
  0x26   :  { %794 = vsyncadd [#allocation6], 4294963776  ;;  %v801_v0 = vmov 0.0   ;;  %vm802_vm0 = vmmov 0   ;;  %v695_v1 = vld [vmem:[#allocation5] ss:$20 sps:$4 sm:$0xff]  }
  0x27   :  { %606 = vmatprep.subr.bf16.mxu0 %v801_v0  ;;  %622 = vmatprep.subr.bf16.mxu1 %v801_v0  ;;  %v696_v2 = vld [vmem:[#allocation5 + $0x4] ss:$20 sps:$4 sm:$0xff]   ;;  %v697_v3 = vld [vmem:[#allocation5 + $0x28] ss:$20 sps:$4 sm:$0xff]   ;;  %v698_v4 = vld [vmem:[#allocation5 + $0x2c] ss:$20 sps:$4 sm:$0xff]  }
  0x28   :  { %618 = vmatprep.mubr.msk.bf16.mxu0 %vm802_vm0, %v801_v0  ;;  %634 = vmatprep.mubr.msk.bf16.mxu1 %vm802_vm0, %v801_v0  ;;  %v699_v5 = vld [vmem:[#allocation5 + $0x50] ss:$20 sps:$4 sm:$0xff]   ;;  %v700_v6 = vld [vmem:[#allocation5 + $0x54] ss:$20 sps:$4 sm:$0xff]   ;;  %v701_v7 = vld [vmem:[#allocation5 + $0x78] ss:$20 sps:$4 sm:$0xff]  }
  0x29   :  { %607 = vmatpush3.bf16.msra.mxu0 %v695_v1  ;;  %623 = vmatpush3.bf16.msra.mxu1 %v696_v2  ;;  %v702_v8 = vld [vmem:[#allocation5 + $0x7c] ss:$20 sps:$4 sm:$0xff]   ;;  %v705_v9 = vld [vmem:[#allocation5 + $0xc8] ss:$0 sps:$4 sm:$0x33]   ;;  %vm96_vm1 = vcmask 1041408  }
  0x2a   :  { %608 = vmatprep.subr.bf16.mxu0 %v801_v0  ;;  %624 = vmatprep.subr.bf16.mxu1 %v801_v0  ;;  %v703_v10 = vld [vmem:[#allocation5 + $0xa0] ss:$20 sps:$4 sm:$0xff]   ;;  %v706_v11 = vld [vmem:[#allocation5 + $0xcc] ss:$0 sps:$4 sm:$0x33]   ;;  %v98_v13 = vsel %vm96_vm1, %v705_v9, 0 }
  0x2b   :  { %v704_v12 = vld [vmem:[#allocation5 + $0xa4] ss:$20 sps:$4 sm:$0xff]   ;;  %v185_v14 = vsel %vm96_vm1, %v706_v11, 0  ;;  %vm92_vm2 = vcmask 687104   ;;  %v880_v15 = vld [vmem:[#allocation2] sm:$0xf] }
  0x2c   :  { %v707_v16 = vld [vmem:[#allocation5 + $0x8] ss:$20 sps:$4 sm:$0xff]   ;;  %v708_v17 = vld [vmem:[#allocation5 + $0xc] ss:$20 sps:$4 sm:$0xff]   ;;  %v709_v18 = vld [vmem:[#allocation5 + $0x30] ss:$20 sps:$4 sm:$0xff]  }
  0x2d   :  { %609 = vmatpush3.bf16.msra.mxu0 %v697_v3  ;;  %625 = vmatpush3.bf16.msra.mxu1 %v698_v4  ;;  %v710_v19 = vld [vmem:[#allocation5 + $0x34] ss:$20 sps:$4 sm:$0xff]   ;;  %v711_v20 = vld [vmem:[#allocation5 + $0x58] ss:$20 sps:$4 sm:$0xff]   ;;  %v712_v21 = vld [vmem:[#allocation5 + $0x5c] ss:$20 sps:$4 sm:$0xff]  }
  0x2e   :  { %610 = vmatprep.subr.bf16.mxu0 %v801_v0  ;;  %626 = vmatprep.subr.bf16.mxu1 %v801_v0  ;;  %v713_v22 = vld [vmem:[#allocation5 + $0x80] ss:$20 sps:$4 sm:$0xff]   ;;  %v714_v23 = vld [vmem:[#allocation5 + $0x84] ss:$20 sps:$4 sm:$0xff]   ;;  %v715_v24 = vld [vmem:[#allocation5 + $0xa8] ss:$20 sps:$4 sm:$0xff]  }
  0x2f   :  { %v716_v25 = vld [vmem:[#allocation5 + $0xac] ss:$20 sps:$4 sm:$0xff]   ;;  %v717_v26 = vld [vmem:[#allocation5 + $0xd0] ss:$0 sps:$4 sm:$0x33]   ;;  %s803_s15 = smov 64  }
  0x30   :  { %v718_v27 = vld [vmem:[#allocation5 + $0xd4] ss:$0 sps:$4 sm:$0x33]   ;;  %v273_v28 = vsel %vm96_vm1, %v717_v26, 0  ;;  %v719_v30 = vld [vmem:[#allocation5 + $0x10] ss:$20 sps:$4 sm:$0xff]  }
  0x31   :  { %611 = vmatpush3.bf16.msra.mxu0 %v699_v5  ;;  %627 = vmatpush3.bf16.msra.mxu1 %v700_v6  ;;  %v361_v29 = vsel %vm96_vm1, %v718_v27, 0  ;;  %v720_v31 = vld [vmem:[#allocation5 + $0x38] ss:$20 sps:$4 sm:$0xff]   ;;  %v721_v32 = vld [vmem:[#allocation5 + $0x60] ss:$20 sps:$4 sm:$0xff]   ;;  %s804_s16 = smov 96  }
  0x32   :  { %612 = vmatprep.subr.bf16.mxu0 %v801_v0  ;;  %628 = vmatprep.subr.bf16.mxu1 %v801_v0  ;;  %v722_v33 = vld [vmem:[#allocation5 + $0x88] ss:$20 sps:$4 sm:$0xff]   ;;  %v723_v34 = vld [vmem:[#allocation5 + $0xb0] ss:$20 sps:$4 sm:$0xff]   ;;  %s805_s19 = smov [#allocation7]   ;;  %vm516_vm3 = vcmask 261120  }
  0x33   :  { %v724_v35 = vld [vmem:[#allocation5 + $0xd8] ss:$0 sps:$4 sm:$0x33]   ;;  %v562_v56 = vld [vmem:[%s939_s2] ss:$0 sm:$0xff]  ;;  %s524_s2 = sshll.u32 %s805_s19, 4  ;;  %s525_s2 = int_to_ptr.vmem [resolvable:$true] %s524_s2 }
  0x34   :  { %v455_v36 = vsel %vm96_vm1, %v724_v35, 0  ;;  %v570_v2 = vld [vmem:[%s940_s3] ss:$0 sm:$0xff]  ;;  %s769_s20 = scalar_lea.vmem %s525_s2, 128  ;;  %p774_p3 = scmp.lt.s32.totalorder %s525_s2, %s525_s2 }
  0x35   :  { %613 = vmatpush3.bf16.msra.mxu0 %v701_v7  ;;  %629 = vmatpush3.bf16.msra.mxu1 %v702_v8  ;;  %p770_p2 = scmp.ne.s32.totalorder %s525_s2, %s769_s20  ;;  %p775_p4 = scmp.lt.s32.totalorder %s769_s20, %s769_s20 }
  0x36   :  { %614 = vmatprep.subr.bf16.mxu0 %v801_v0  ;;  %630 = vmatprep.subr.bf16.mxu1 %v801_v0 }
  0x37   :  { %p776_p5 = por %p775_p4, %p774_p3 }
  0x39   :  { %615 = vmatpush3.bf16.msra.mxu0 %v703_v10  ;;  %631 = vmatpush3.bf16.msra.mxu1 %v704_v12  ;;  %p777_p6 = pnand %p776_p5, %p770_p2 }
  0x3a   :  { %616 = vmatprep.subr.bf16.mxu0 %v801_v0  ;;  %632 = vmatprep.subr.bf16.mxu1 %v801_v0 }
  0x3d   :  { %617 = vmatpush3.bf16.msra.mxu0 %v98_v13  ;;  %633 = vmatpush3.bf16.msra.mxu1 %v185_v14 }
  0x3e   :  { %638 = vmatprep.subr.bf16.mxu0 %v801_v0  ;;  %654 = vmatprep.subr.bf16.mxu1 %v801_v0 }
  0x40   :  { %619 = vmatmul.mubr.msk.bf16.vlgmr.msra.gmra.mrb[0].mxu0 %vm92_vm2, %v880_v15  ;;  %635 = vmatmul.mubr.msk.bf16.vlgmr.msra.gmra.mrb[0].mxu1 %vm92_vm2, %v880_v15 }
  0x41   :  { %639 = vmatpush3.bf16.msra.mxu0 %v707_v16  ;;  %655 = vmatpush3.bf16.msra.mxu1 %v708_v17 }
  0x42   :  { %640 = vmatprep.subr.bf16.mxu0 %v801_v0  ;;  %656 = vmatprep.subr.bf16.mxu1 %v801_v0 }
  0x43   :  { %650 = vmatprep.mubr.msk.bf16.mxu0 %vm802_vm0, %v801_v0  ;;  %666 = vmatprep.mubr.msk.bf16.mxu1 %vm802_vm0, %v801_v0 }
  0x45   :  { %641 = vmatpush3.bf16.msra.mxu0 %v709_v18  ;;  %657 = vmatpush3.bf16.msra.mxu1 %v710_v19 }
  0x46   :  { %642 = vmatprep.subr.bf16.mxu0 %v801_v0  ;;  %658 = vmatprep.subr.bf16.mxu1 %v801_v0 }
  0x49   :  { %643 = vmatpush3.bf16.msra.mxu0 %v711_v20  ;;  %659 = vmatpush3.bf16.msra.mxu1 %v712_v21 }
  0x4a   :  { %644 = vmatprep.subr.bf16.mxu0 %v801_v0  ;;  %660 = vmatprep.subr.bf16.mxu1 %v801_v0 }
  0x4d   :  { %645 = vmatpush3.bf16.msra.mxu0 %v713_v22  ;;  %661 = vmatpush3.bf16.msra.mxu1 %v714_v23 }
  0x4e   :  { %646 = vmatprep.subr.bf16.mxu0 %v801_v0  ;;  %662 = vmatprep.subr.bf16.mxu1 %v801_v0 }
  0x51   :  { %647 = vmatpush3.bf16.msra.mxu0 %v715_v24  ;;  %663 = vmatpush3.bf16.msra.mxu1 %v716_v25 }
  0x52   :  { %648 = vmatprep.subr.bf16.mxu0 %v801_v0  ;;  %664 = vmatprep.subr.bf16.mxu1 %v801_v0 }
  0x55   :  { %649 = vmatpush3.bf16.msra.mxu0 %v273_v28  ;;  %665 = vmatpush3.bf16.msra.mxu1 %v361_v29 }
  0x56   :  { %670 = vmatprep.subr.bf16.mxu0 %v801_v0 }
  0x58   :  { %651 = vmatmul.mubr.msk.bf16.vlgmr.msra.gmra.mrb[4].mxu0 %vm92_vm2, %v880_v15  ;;  %667 = vmatmul.mubr.msk.bf16.vlgmr.msra.gmra.mrb[4].mxu1 %vm92_vm2, %v880_v15 }
  0x59   :  { %671 = vmatpush3.bf16.msra.mxu0 %v719_v30  ;;  %682 = vmatprep.mubr.msk.bf16.mxu0 %vm802_vm0, %v801_v0 }
  0x5a   :  { %672 = vmatprep.subr.bf16.mxu0 %v801_v0 }
  0x5d   :  { %673 = vmatpush3.bf16.msra.mxu0 %v720_v31 }
  0x5e   :  { %674 = vmatprep.subr.bf16.mxu0 %v801_v0 }
  0x61   :  { %675 = vmatpush3.bf16.msra.mxu0 %v721_v32 }
  0x62   :  { %676 = vmatprep.subr.bf16.mxu0 %v801_v0 }
  0x65   :  { %677 = vmatpush3.bf16.msra.mxu0 %v722_v33 }
  0x66   :  { %678 = vmatprep.subr.bf16.mxu0 %v801_v0 }
  0x69   :  { %679 = vmatpush3.bf16.msra.mxu0 %v723_v34 }
  0x6a   :  { %680 = vmatprep.subr.bf16.mxu0 %v801_v0 }
  0x6d   :  { %681 = vmatpush3.bf16.msra.mxu0 %v455_v36 }
  0x70   :  { %683 = vmatmul.mubr.msk.bf16.vlgmr.msra.gmra.mrb[8].mxu0 %vm92_vm2, %v880_v15 }
 0x113   :  { %v134_v37 = vpop.f32.mrb[0].mxu0  ;;  %v221_v39 = vpop.f32.mrb[0].mxu1 }
 0x114   :  { %v620_v38 = vpop.f32.mrb[1].mxu0  ;;  %v227_v40 = vmax.f32 %v134_v37, %v221_v39  ;;  %v636_v42 = vpop.f32.mrb[1].mxu1 }
 0x115   :  { %v137_v41 = vpop.f32.mrb[2].mxu0  ;;  %v224_v44 = vpop.f32.mrb[2].mxu1 }
 0x116   :  { %v621_v43 = vpop.f32.mrb[3].mxu0  ;;  %v637_v45 = vpop.f32.mrb[3].mxu1 }
 0x12b   :  { %v309_v46 = vpop.f32.mrb[4].mxu0  ;;  %v397_v49 = vpop.f32.mrb[4].mxu1 }
 0x12c   :  { %v315_v47 = vmax.f32 %v227_v40, %v309_v46  ;;  %v652_v48 = vpop.f32.mrb[5].mxu0  ;;  %v668_v51 = vpop.f32.mrb[5].mxu1 }
 0x12d   :  { %v312_v50 = vpop.f32.mrb[6].mxu0  ;;  %v400_v54 = vpop.f32.mrb[6].mxu1 }
 0x12e   :  { %v403_v52 = vmax.f32 %v315_v47, %v397_v49  ;;  %v653_v53 = vpop.f32.mrb[7].mxu0  ;;  %v669_v55 = vpop.f32.mrb[7].mxu1 }
 0x143   :  { %v491_v57 = vpop.f32.mrb[8].mxu0 }
 0x144   :  { %v492_v58 = vadd.f32 %v562_v56, %v491_v57  ;;  %v684_v59 = vpop.f32.mrb[9].mxu0 }
 0x145   :  { %v494_v60 = vpop.f32.mrb[10].mxu0 }
 0x146   :  { %v685_v61 = vpop.f32.mrb[11].mxu0  ;;  %v497_v62 = vmax.f32 %v403_v52, %v492_v58 }
 0x148   :  { %499 = vrot.lane.b32.xlu0 %v497_v62, %s803_s15 }
 0x1ba   :  { %v500_v63 = vpop.permute.xlu0 %499 }
 0x1bb   :  { %v502_v0 = vmax.f32 %v497_v62, %v500_v63 }
 0x1bd   :  { %504 = vrot.lane.b32.xlu0 %v502_v0, %s804_s16 }
 0x22f   :  { %v505_v1 = vpop.permute.xlu0 %504 }
 0x230   :  { %v507_v3 = vmax.f32 %v502_v0, %v505_v1 }
 0x232   :  { %v514_v4 = vadd.f32 %v570_v2, %v507_v3 }
 0x234   :  { %v515_v5 = vmax.f32 %v514_v4, 0.0 }
 0x236   :  { %517 = vst.msk [vmem:[#allocation7] sm:$0xff] %vm516_vm3, %v515_v5 }
 0x237   :  { %780 = shalt.err (!%p777_p6)
}
 0x238   :  { %s781_s23 = scalar_lea.hbm %s941_s4, 128 }
 0x239   :  { %p782_p7 = scmp.ne.s32.totalorder %s941_s4, %s781_s23  ;;  %p785_p8 = scmp.lt.u32.totalorder %s781_s23, %s941_s4 }
 0x23b   :  { %p787_p9 = pnand %p785_p8, %p782_p7 }
 0x23d   :  { %790 = shalt.err (!%p787_p9)
}
 0x23e   :  { %527 = dma.vmem_to_hbm [thread:$0]  %s525_s2, 128, %s941_s4, [#allocation4]  }
 0x23f   :  { %795 = dma.done.wait [#allocation4], 128  }
 0x240   :  { %796 = vsyncadd [#allocation4], 4294967168 }
 0x241   :  { %531 = vsyncpa [#allocation3], 1 }
 0x242   :  { %532 = vsyncpa [#allocation6], 1 }
 0x243   :  { %533 = vsyncpa [#allocation4], 1 }

</bundles_post_ra>
